<compile_context>
chip_gen: v7x
topology: tpu7x:2x2x1
jax: 0.10.0
libtpu: 0.0.40
codegen_flags: <defaults>
</compile_context>

<pallas_src>
import math

import jax
import jax.numpy as jnp
from jax.experimental import pallas as pl
from jax.experimental.pallas import tpu as pltpu


def _attention_kernel(w1_ref, b1_ref, vq_ref, w2_ref, w3_ref, b3_ref, vi_ref, out_ref):
    # q = W1 @ v_q + b1  -> (A, 1)   (== ln1(V_Q)[0], kept as a column vector)
    q = jnp.dot(w1_ref[...], vq_ref[...], preferred_element_type=jnp.float32) + b1_ref[...]

    # x2^T = W2 @ V_I^T  -> (A, R)   (== ln2(V_I) for this batch, transposed)
    x2t = jnp.dot(w2_ref[...], vi_ref[0], preferred_element_type=jnp.float32)

    # broadcast-add of the query projection (over the lane axis), then tanh
    ht = jnp.tanh(x2t + q)                                            # (A, R)
    # TODO(synk): nn.Dropout(0.5) is treated as inference-mode identity (no RNG mask).

    # scores s = w3 @ h^T + b3 -> (1, R), already lane-dense
    s = jnp.dot(w3_ref[...], ht, preferred_element_type=jnp.float32) + b3_ref[...]

    # softmax over the R=196 regions (lane axis)
    m = jnp.max(s, axis=-1, keepdims=True)
    e = jnp.exp(s - m)
    denom = jnp.sum(e, axis=-1, keepdims=True)
    out_ref[0] = (e / denom).astype(out_ref.dtype)


def attention_forward(V_I, V_Q, w1, b1, w2, w3, b3, *, regions=196):
    """Forward of the PyTorch Attention module.

    V_I : (B*regions, input_size)  image features
    V_Q : (q_rows, input_size)     query features (only row 0 is used, as in the module)
    w1  : (atten_size, input_size), b1: (atten_size,)   -- ln1
    w2  : (atten_size, input_size)                      -- ln2 (no bias)
    w3  : (1, atten_size),          b3: (1,)            -- ln3
    returns p : (B, regions)
    """
    n_rows, input_size = V_I.shape
    atten_size = w1.shape[0]
    assert n_rows % regions == 0, "V_I row count must be a multiple of 196"
    batch = n_rows // regions

    # Lay V_I out as (B, input_size, regions) so matmuls need no in-kernel transpose.
    vi_t = jnp.transpose(V_I.reshape(batch, regions, input_size), (0, 2, 1))
    vq_col = V_Q[0:1, :].T.astype(jnp.float32)        # (input_size, 1)
    b1_col = b1.reshape(atten_size, 1)
    b3_mat = b3.reshape(1, 1)

    out = pl.pallas_call(
        _attention_kernel,
        out_shape=jax.ShapeDtypeStruct((batch, 1, regions), jnp.float32),
        grid_spec=pltpu.PrefetchScalarGridSpec(
            num_scalar_prefetch=0,
            grid=(batch,),
            in_specs=[
                pl.BlockSpec((atten_size, input_size), lambda b: (0, 0)),     # w1
                pl.BlockSpec((atten_size, 1), lambda b: (0, 0)),              # b1 (col)
                pl.BlockSpec((input_size, 1), lambda b: (0, 0)),              # v_q (col)
                pl.BlockSpec((atten_size, input_size), lambda b: (0, 0)),     # w2
                pl.BlockSpec((1, atten_size), lambda b: (0, 0)),              # w3
                pl.BlockSpec((1, 1), lambda b: (0, 0)),                       # b3
                pl.BlockSpec((1, input_size, regions), lambda b: (b, 0, 0)),  # V_I^T block
            ],
            out_specs=pl.BlockSpec((1, 1, regions), lambda b: (b, 0, 0)),
        ),
        compiler_params=pltpu.CompilerParams(
            dimension_semantics=("parallel",),  # batch axis is embarrassingly parallel (v7x megacore)
        ),
    )(w1, b1_col, vq_col, w2, w3, b3_mat, vi_t)

    return out.reshape(batch, regions)


if __name__ == "__main__":
    # Small config consistent with the module: 196 regions/batch (hard-coded in the
    # PyTorch .view(-1, 196)), batch=2, input_size=32, atten_size=64.
    input_size = 32
    atten_size = 64
    regions = 196
    batch = 2
    n_rows = batch * regions

    key = jax.random.PRNGKey(0)
    k = jax.random.split(key, 7)

    # nn.Linear default init: U(-1/sqrt(fan_in), 1/sqrt(fan_in))
    s1 = 1.0 / math.sqrt(input_size)
    s3 = 1.0 / math.sqrt(atten_size)
    w1 = jax.random.uniform(k[0], (atten_size, input_size), jnp.float32, -s1, s1)
    b1 = jax.random.uniform(k[1], (atten_size,), jnp.float32, -s1, s1)
    w2 = jax.random.uniform(k[2], (atten_size, input_size), jnp.float32, -s1, s1)
    w3 = jax.random.uniform(k[3], (1, atten_size), jnp.float32, -s3, s3)
    b3 = jax.random.uniform(k[4], (1,), jnp.float32, -s3, s3)

    V_I = jax.random.normal(k[5], (n_rows, input_size), jnp.float32)
    V_Q = jax.random.normal(k[6], (1, input_size), jnp.float32)

    p = attention_forward(V_I, V_Q, w1, b1, w2, w3, b3, regions=regions)
    p = jax.block_until_ready(p)

    # plain-JAX reference (same math as the PyTorch forward in eval mode)
    x1 = V_Q @ w1.T + b1                       # (1, A)
    x2 = V_I @ w2.T + x1[0]                    # (N, A) with broadcast-added x1[0]
    h = jnp.tanh(x2)
    s = (h @ w3.T + b3).reshape(-1, regions)   # (B, 196)
    ref = jax.nn.softmax(s, axis=-1)

    assert p.shape == (batch, regions)
    assert jnp.allclose(jnp.sum(p, axis=-1), 1.0, atol=1e-5), "softmax rows must sum to 1"
    assert jnp.allclose(p, ref, atol=1e-4, rtol=1e-3), "Pallas attention mismatch vs reference"

    print("KERNEL_OK")
</pallas_src>

<mosaic_0001>
module attributes {stable_mosaic.version = 11 : i64} {
  func.func @_attention_kernel(%arg0: i32, %arg1: memref<64x32xf32, #tpu.memory_space<vmem>>, %arg2: memref<64x1xf32, #tpu.memory_space<vmem>>, %arg3: memref<32x1xf32, #tpu.memory_space<vmem>>, %arg4: memref<64x32xf32, #tpu.memory_space<vmem>>, %arg5: memref<1x64xf32, #tpu.memory_space<vmem>>, %arg6: memref<1x1xf32, #tpu.memory_space<vmem>>, %arg7: memref<1x32x196xf32, #tpu.memory_space<vmem>>, %arg8: memref<1x1x196xf32, #tpu.memory_space<vmem>>) attributes {dimension_semantics = [#tpu.dimension_semantics<parallel>], iteration_bounds = array<i64: 2>, scalar_prefetch = 0 : i64, scratch_operands = 0 : i64, tpu.core_type = #tpu.core_type<tc>, window_params = [{pipeline_mode = #tpu.pipeline_mode<synchronous>, transform_indices = @transform_0, window_bounds = array<i64: 64, 32>}, {pipeline_mode = #tpu.pipeline_mode<synchronous>, transform_indices = @transform_1, window_bounds = array<i64: 64, 1>}, {pipeline_mode = #tpu.pipeline_mode<synchronous>, transform_indices = @transform_2, window_bounds = array<i64: 32, 1>}, {pipeline_mode = #tpu.pipeline_mode<synchronous>, transform_indices = @transform_3, window_bounds = array<i64: 64, 32>}, {pipeline_mode = #tpu.pipeline_mode<synchronous>, transform_indices = @transform_4, window_bounds = array<i64: 1, 64>}, {pipeline_mode = #tpu.pipeline_mode<synchronous>, transform_indices = @transform_5, window_bounds = array<i64: 1, 1>}, {transform_indices = @transform_6, window_bounds = array<i64: 1, 32, 196>}, {transform_indices = @transform_7, window_bounds = array<i64: 1, 1, 196>}]} {
    %c0 = arith.constant 0 : index
    %c0_0 = arith.constant 0 : index
    %0 = vector.load %arg1[%c0, %c0_0] : memref<64x32xf32, #tpu.memory_space<vmem>>, vector<64x32xf32>
    %c0_1 = arith.constant 0 : index
    %c0_2 = arith.constant 0 : index
    %1 = vector.load %arg3[%c0_1, %c0_2] : memref<32x1xf32, #tpu.memory_space<vmem>>, vector<32x1xf32>
    %cst = arith.constant dense<0.000000e+00> : vector<64x1xf32>
    %2 = tpu.matmul %0, %1, %cst {dimension_numbers = #tpu.dot_dimension_numbers<[1], [0], [0], [1], [0, 0, 1, 1], [], []>} : vector<64x32xf32>, vector<32x1xf32>, vector<64x1xf32> -> vector<64x1xf32>
    %c0_3 = arith.constant 0 : index
    %c0_4 = arith.constant 0 : index
    %3 = vector.load %arg2[%c0_3, %c0_4] : memref<64x1xf32, #tpu.memory_space<vmem>>, vector<64x1xf32>
    %4 = arith.addf %2, %3 : vector<64x1xf32>
    %c0_5 = arith.constant 0 : index
    %c0_6 = arith.constant 0 : index
    %5 = vector.load %arg4[%c0_5, %c0_6] : memref<64x32xf32, #tpu.memory_space<vmem>>, vector<64x32xf32>
    %c0_7 = arith.constant 0 : index
    %c0_8 = arith.constant 0 : index
    %c0_9 = arith.constant 0 : index
    %6 = vector.load %arg7[%c0_7, %c0_8, %c0_9] : memref<1x32x196xf32, #tpu.memory_space<vmem>>, vector<1x32x196xf32>
    %7 = vector.shape_cast %6 : vector<1x32x196xf32> to vector<32x196xf32>
    %cst_10 = arith.constant dense<0.000000e+00> : vector<64x196xf32>
    %8 = tpu.matmul %5, %7, %cst_10 {dimension_numbers = #tpu.dot_dimension_numbers<[1], [0], [0], [1], [0, 0, 1, 1], [], []>} : vector<64x32xf32>, vector<32x196xf32>, vector<64x196xf32> -> vector<64x196xf32>
    %9 = vector.broadcast %4 : vector<64x1xf32> to vector<64x196xf32>
    %10 = arith.addf %8, %9 : vector<64x196xf32>
    %11 = math.tanh %10 : vector<64x196xf32>
    %c0_11 = arith.constant 0 : index
    %c0_12 = arith.constant 0 : index
    %12 = vector.load %arg5[%c0_11, %c0_12] : memref<1x64xf32, #tpu.memory_space<vmem>>, vector<1x64xf32>
    %cst_13 = arith.constant dense<0.000000e+00> : vector<1x196xf32>
    %13 = tpu.matmul %12, %11, %cst_13 {dimension_numbers = #tpu.dot_dimension_numbers<[1], [0], [0], [1], [0, 0, 1, 1], [], []>} : vector<1x64xf32>, vector<64x196xf32>, vector<1x196xf32> -> vector<1x196xf32>
    %c0_14 = arith.constant 0 : index
    %c0_15 = arith.constant 0 : index
    %14 = vector.load %arg6[%c0_14, %c0_15] : memref<1x1xf32, #tpu.memory_space<vmem>>, vector<1x1xf32>
    %15 = vector.broadcast %14 : vector<1x1xf32> to vector<1x196xf32>
    %16 = arith.addf %13, %15 : vector<1x196xf32>
    %cst_16 = arith.constant dense<0xFF800000> : vector<1xf32>
    %17 = vector.multi_reduction <maximumf>, %16, %cst_16 [1] : vector<1x196xf32> to vector<1xf32>
    %18 = vector.shape_cast %17 : vector<1xf32> to vector<1x1xf32>
    %19 = vector.broadcast %18 : vector<1x1xf32> to vector<1x196xf32>
    %20 = arith.subf %16, %19 : vector<1x196xf32>
    %21 = math.exp %20 : vector<1x196xf32>
    %cst_17 = arith.constant dense<0.000000e+00> : vector<1xf32>
    %22 = vector.multi_reduction <add>, %21, %cst_17 [1] : vector<1x196xf32> to vector<1xf32>
    %23 = vector.shape_cast %22 : vector<1xf32> to vector<1x1xf32>
    %24 = vector.broadcast %23 : vector<1x1xf32> to vector<1x196xf32>
    %25 = arith.divf %21, %24 : vector<1x196xf32>
    %c0_18 = arith.constant 0 : index
    %c0_19 = arith.constant 0 : index
    %c0_20 = arith.constant 0 : index
    %26 = vector.load %arg8[%c0_18, %c0_19, %c0_20] : memref<1x1x196xf32, #tpu.memory_space<vmem>>, vector<1x1x196xf32>
    %27 = vector.shape_cast %26 : vector<1x1x196xf32> to vector<1x196xf32>
    %28 = vector.shape_cast %25 : vector<1x196xf32> to vector<1x1x196xf32>
    tpu.vector_store %arg8[%c0_18, %c0_19, %c0_20], %28 {strides = array<i32>} : memref<1x1x196xf32, #tpu.memory_space<vmem>>, vector<1x1x196xf32>,
    return
  }
  func.func @transform_0(%arg0: i32) -> (i32, i32) {
    %c0_i32 = arith.constant 0 : i32
    %c0_i32_0 = arith.constant 0 : i32
    %c0_i32_1 = arith.constant 0 : i32
    return %c0_i32, %c0_i32_0 : i32, i32
  }
  func.func @transform_1(%arg0: i32) -> (i32, i32) {
    %c0_i32 = arith.constant 0 : i32
    %c0_i32_0 = arith.constant 0 : i32
    %c0_i32_1 = arith.constant 0 : i32
    return %c0_i32, %c0_i32_0 : i32, i32
  }
  func.func @transform_2(%arg0: i32) -> (i32, i32) {
    %c0_i32 = arith.constant 0 : i32
    %c0_i32_0 = arith.constant 0 : i32
    %c0_i32_1 = arith.constant 0 : i32
    return %c0_i32, %c0_i32_0 : i32, i32
  }
  func.func @transform_3(%arg0: i32) -> (i32, i32) {
    %c0_i32 = arith.constant 0 : i32
    %c0_i32_0 = arith.constant 0 : i32
    %c0_i32_1 = arith.constant 0 : i32
    return %c0_i32, %c0_i32_0 : i32, i32
  }
  func.func @transform_4(%arg0: i32) -> (i32, i32) {
    %c0_i32 = arith.constant 0 : i32
    %c0_i32_0 = arith.constant 0 : i32
    %c0_i32_1 = arith.constant 0 : i32
    return %c0_i32, %c0_i32_0 : i32, i32
  }
  func.func @transform_5(%arg0: i32) -> (i32, i32) {
    %c0_i32 = arith.constant 0 : i32
    %c0_i32_0 = arith.constant 0 : i32
    %c0_i32_1 = arith.constant 0 : i32
    return %c0_i32, %c0_i32_0 : i32, i32
  }
  func.func @transform_6(%arg0: i32) -> (i32, i32, i32) {
    %c0_i32 = arith.constant 0 : i32
    %c0_i32_0 = arith.constant 0 : i32
    %c0_i32_1 = arith.constant 0 : i32
    return %arg0, %c0_i32, %c0_i32_0 : i32, i32, i32
  }
  func.func @transform_7(%arg0: i32) -> (i32, i32, i32) {
    %c0_i32 = arith.constant 0 : i32
    %c0_i32_0 = arith.constant 0 : i32
    %c0_i32_1 = arith.constant 0 : i32
    return %arg0, %c0_i32, %c0_i32_0 : i32, i32, i32
  }
}

</mosaic_0001>

<bundles_post_ra>
// kernel: tpu_custom_call.1
= control target key start
LH: loop header
LB: loop body
LE: loop exit
PB: predicated region body
PF: predicated region fallthrough
CT: control target
= control target key end

     0   :  { %s1337_s0 = inlined_call_operand.vmem [shape: f32[64,32], index: 0, kind: input, shape index: {}]   ;;  %s1338_s1 = inlined_call_operand.vmem [shape: f32[64,1], index: 1, kind: input, shape index: {}]   ;;  %s1339_s2 = inlined_call_operand.vmem [shape: f32[32,1], index: 2, kind: input, shape index: {}]   ;;  %s1340_s3 = inlined_call_operand.vmem [shape: f32[64,32], index: 3, kind: input, shape index: {}]   ;;  %s1341_s4 = inlined_call_operand.vmem [shape: f32[1,64], index: 4, kind: input, shape index: {}]   ;;  %s1342_s5 = inlined_call_operand.<no memory space> [shape: f32[1,1], index: 5, kind: input, shape index: {}]   ;;  %s1343_s6 = inlined_call_operand.vmem [shape: f32[2,32,196], index: 6, kind: input, shape index: {}]   ;;  %s1344_s7 = inlined_call_operand.hbm [shape: f32[2,1,196], index: 7, kind: output, shape index: {}]  }
   0x1   :  { %v12_v0 = vstv %s1342_s5 }
   0x2   :  { %13 = vst [vmem:[#allocation2] sm:$0x1] %v12_v0 }
   0x3   :  { %14 = vsyncpa [#allocation4], 0 }
   0x4   :  { %16 = vsyncpa [#allocation4 + $0x1], 0  ;;  %s1130_s26 = smov 0   ;;  %s1132_s27 = smov 0  }
   0x5   :  { %s1134_s28 = smov 0   ;;  %s1136_s29 = smov 0  }
   0x6 LB: > { %s1151_s5 = sadd.s32 4294967295, %s1081_s29   ;;  %s842_s30 = sadd.s32 4294967294, %s1081_s29   ;;  %s1081_s29 = sphi %s1136_s29, %s1350_s29   ;;  %s1077_s28 = sphi %s1134_s28, %s1349_s28   ;;  %s1073_s27 = sphi %s1132_s27, %s1348_s27   ;;  %s1069_s26 = sphi %s1130_s26, %s1347_s26  }
   0x7   : > { %s1155_s8 = sadd.s32 1, %s1081_s29   ;;  %s181_s9 = sadd.s32 1, %s1077_s28 }
   0x8   : > { %s178_s10 = ssub.s32 %s1081_s29, %s1155_s8  ;;  %p191_p0 = scmp.ne.s32.totalorder %s1077_s28, %s1073_s27 }
   0x9   : > { %p179_p1 = scmp.eq.s32.totalorder %s178_s10, 0  ;;  %p192_p2 = scmp.eq.s32.totalorder %s1151_s5, 1 }
   0xa   : > { %p197_p3 = scmp.ne.s32.totalorder %s1073_s27, %s1069_s26  ;;  %p198_p4 = scmp.eq.s32.totalorder %s842_s30, 1 }
   0xb   : > { %s1166_s11 = scalar_select %p179_p1, %s1077_s28, %s181_s9  }
   0xc   : > { %p1168_p5 = por %p192_p2, %p191_p0  ;;  %p1172_p6 = por %p198_p4, %p197_p3 }
   0xd   : > { %p845_p7 = scmp.ge.s32.totalorder %s1081_s29, 1  ;;  %p242_p8 = scmp.lt.s32.totalorder %s1081_s29, 3 }
   0xf   : > { %p243_p9 = pnand %p845_p7, %p242_p8 }
  0x10   : > { %v287_v1 = vld [vmem:[%s1339_s2] sm:$0xff] (!%p243_p9)  ;;  %v288_v2 = vld [vmem:[%s1339_s2 + $0x8] sm:$0xff] (!%p243_p9)  ;;  %v289_v3 = vld [vmem:[%s1339_s2 + $0x10] sm:$0xff] (!%p243_p9)  ;;  %vm299_vm0 = vcmask (!%p243_p9), 261120   ;;  %p274_p10 = scmp.lt.s32.totalorder (!%p243_p9), %s1151_s5, 1  ;;  %v1083_v7 = vmov (!%p243_p9), 0.0  }
  0x11   : > { %246 = sbr.rel (%p243_p9) target bundleno = 961 (0x3c1), region = 48  ;;  %v905_v4 = vpack.c.bf16 (!%p243_p9), %v288_v2, %v287_v1  ;;  %v290_v5 = vld [vmem:[%s1339_s2 + $0x18] sm:$0xff] (!%p243_p9)  ;;  %v279_v6 = vld [vmem:[%s1337_s0] sm:$0xff] (!%p243_p9)  ;;  %573 = vmatprep.mubr.f32.mxu1 (!%p243_p9), %v1083_v7  ;;  %v280_v16 = vld [vmem:[%s1337_s0 + $0x8] sm:$0xff] (!%p243_p9)  ;;  %v1084_v36 = vmov (!%p243_p9), 0   ;;  %vm649_vm1 = vcmask (!%p243_p9), 523264  }
  0x12   : > { %v909_v8 = vpack.c.bf16 (!%p243_p9), %v290_v5, %v289_v3  ;;  %893 = vmatprep.mubr.msk.f32.mxu0 (!%p243_p9), %vm299_vm0, %v279_v6  ;;  %v281_v21 = vld [vmem:[%s1337_s0 + $0x10] sm:$0xff] (!%p243_p9)  ;;  %v282_v23 = vld [vmem:[%s1337_s0 + $0x18] sm:$0xff] (!%p243_p9)  ;;  %v283_v24 = vld [vmem:[%s1337_s0 + $0x20] sm:$0xff] (!%p243_p9)  ;;  %979 = vset.pattern.permute.xlu0 (!%p243_p9), %v1084_v36  ;;  %vm724_vm2 = vcmask (!%p243_p9), 1040384   ;;  %vm726_vm3 = vcmask (!%p243_p9), 548864   ;;  %s271_s17 = sand.u32 (!%p243_p9), 1, %s1073_s27  }
  0x13   : > { %906 = vmatprep.subr.bf16.mxu0 (!%p243_p9), %v905_v4  ;;  %v429_v25 = vld [vmem:[%s1340_s3] sm:$0xff] (!%p243_p9)  ;;  %v284_v26 = vld [vmem:[%s1337_s0 + $0x28] sm:$0xff] (!%p243_p9)  ;;  %v285_v27 = vld [vmem:[%s1337_s0 + $0x30] sm:$0xff] (!%p243_p9)  ;;  %980 = vset.pattern.permute.xlu1 (!%p243_p9), %v1084_v36  ;;  %s846_s18 = sshll.u32 (!%p243_p9), %s271_s17, 1  ;;  %s872_s19 = sshll.u32 (!%p243_p9), %s1151_s5, 5 }
  0x14   : > { %908 = vmatpush3.bf16.msra.mxu0 (!%p243_p9), %v905_v4  ;;  %v430_v28 = vld [vmem:[%s1340_s3 + $0x8] sm:$0xff] (!%p243_p9)  ;;  %v286_v29 = vld [vmem:[%s1337_s0 + $0x38] sm:$0xff] (!%p243_p9)  ;;  %v431_v30 = vld [vmem:[%s1340_s3 + $0x10] sm:$0xff] (!%p243_p9)  ;;  %s273_s20 = scalar_lea.vmem (!%p243_p9), [#allocation3], %s846_s18 }
  0x15   : > { %910 = vmatprep.subr.bf16.mxu0 (!%p243_p9), %v909_v8  ;;  %v432_v31 = vld [vmem:[%s1340_s3 + $0x18] sm:$0xff] (!%p243_p9)  ;;  %v433_v32 = vld [vmem:[%s1340_s3 + $0x20] sm:$0xff] (!%p243_p9)  ;;  %v434_v33 = vld [vmem:[%s1340_s3 + $0x28] sm:$0xff] (!%p243_p9)  ;;  %s783_s21 = sshll.u32 (!%p243_p9), %s273_s20, 4  ;;  %s1297_s21 = int_to_ptr.vmem [resolvable:$true] %s783_s21 }
  0x16   : > { %v435_v34 = vld [vmem:[%s1340_s3 + $0x30] sm:$0xff] (!%p243_p9)  ;;  %v436_v35 = vld [vmem:[%s1340_s3 + $0x38] sm:$0xff] (!%p243_p9)  ;;  %v291_v37 = vld [vmem:[%s1338_s1] sm:$0xff] (!%p243_p9)  ;;  %s1019_s30 = scalar_lea.vmem (!%p243_p9), %s1297_s21, 32 }
  0x17   : > { %v294_v41 = vld [vmem:[%s1338_s1 + $0x18] sm:$0xff] (!%p243_p9)  ;;  %v292_v42 = vld [vmem:[%s1338_s1 + $0x8] sm:$0xff] (!%p243_p9)  ;;  %v293_v47 = vld [vmem:[%s1338_s1 + $0x10] sm:$0xff] (!%p243_p9)  ;;  %p1020_p11 = scmp.ne.s32.totalorder (!%p243_p9), %s1297_s21, %s1019_s30 }
  0x18   : > { %s275_s24 = scalar_select %p274_p10, %s1151_s5, 1  ;;  %912 = vmatpush3.bf16.msra.mxu0 %v909_v8  ;;  %v295_v49 = vld [vmem:[%s1338_s1 + $0x20] sm:$0xff]  ;;  %v296_v51 = vld [vmem:[%s1338_s1 + $0x28] sm:$0xff]  ;;  %v297_v58 = vld [vmem:[%s1338_s1 + $0x30] sm:$0xff] }
  0x19   : > { %v298_v60 = vld [vmem:[%s1338_s1 + $0x38] sm:$0xff]  ;;  %v639_v3 = vld [vmem:[#allocation2] sm:$0x1]  ;;  %p1021_p12 = pnand %p1020_p11, %p1168_p5  ;;  %s1086_s5 = smov [#allocation3]  }
  0x1a   : > { %s871_s25 = sshll.u32 %s275_s24, 6  ;;  %s1295_s24 = scalar_lea.hbm %s1344_s7, %s872_s19 }
  0x1b   : > { %s278_s10 = scalar_lea.vmem %s1343_s6, %s871_s25  ;;  %894 = vmatmul.mubr.msk.f32.vlgmr.msra.gmra.mrb[0].mxu0 %vm299_vm0, %v280_v16  ;;  %s769_s25 = scalar_lea.sflag [#allocation4], %s271_s17 }
  0x1c   : > { %v438_v9 = vld [vmem:[%s278_s10 + $0x8] sm:$0xff]  ;;  %v440_v10 = vld [vmem:[%s278_s10 + $0x18] sm:$0xff]  ;;  %v437_v11 = vld [vmem:[%s278_s10] sm:$0xff]  ;;  %896 = vmatprep.mubr.msk.f32.mxu0 %vm299_vm0, %v281_v21  ;;  %p1022_p13 = pneg %p1021_p12  ;;  %s1023_s9 = sshll.u32 %s1086_s5, 4  ;;  %s1024_s9 = int_to_ptr.vmem [resolvable:$false] %s1023_s9 }
  0x1d   : > { %v913_v12 = vpack.c.bf16 %v440_v10, %v438_v9  ;;  %v439_v13 = vld [vmem:[%s278_s10 + $0x10] sm:$0xff]  ;;  %v442_v14 = vld [vmem:[%s278_s10 + $0x28] sm:$0xff]  ;;  %v444_v15 = vld [vmem:[%s278_s10 + $0x38] sm:$0xff]  ;;  %p1026_p0 = scmp.lt.s32.totalorder %s1297_s21, %s1024_s9 }
  0x1e   : > { %v915_v17 = vpack.c.bf16 %v439_v13, %v437_v11  ;;  %v917_v18 = vpack.c.bf16 %v444_v15, %v442_v14  ;;  %v441_v19 = vld [vmem:[%s278_s10 + $0x20] sm:$0xff]  ;;  %v443_v20 = vld [vmem:[%s278_s10 + $0x30] sm:$0xff]  ;;  %s1025_s10 = scalar_lea.vmem %s1024_s9, 64 }
  0x1f   : > { %914 = vmatprep.subr.bf16.mxu1 %v913_v12  ;;  %v919_v22 = vpack.c.bf16 %v443_v20, %v441_v19  ;;  %897 = vmatmul.mubr.msk.f32.gmra.mrb[2].mxu0 %vm299_vm0, %v282_v23  ;;  %p1027_p1 = scmp.lt.s32.totalorder %s1025_s10, %s1019_s30 }
  0x20   : > { %916 = vmatpush1.bf16.msra.mxu1 %v915_v17  ;;  %899 = vmatprep.mubr.msk.f32.mxu0 %vm299_vm0, %v283_v24 }
  0x21   : > { %918 = vmatprep.subr.bf16.mxu1 %v917_v18  ;;  %p1028_p2 = por %p1027_p1, %p1026_p0 }
  0x23   : > { %900 = vmatmul.mubr.msk.f32.gmra.mrb[4].mxu0 %vm299_vm0, %v284_v26  ;;  %p1029_p3 = pnand %p1028_p2, %p1022_p13 }
  0x24   : > { %920 = vmatpush1.bf16.msra.mxu1 %v919_v22  ;;  %902 = vmatprep.mubr.msk.f32.mxu0 %vm299_vm0, %v285_v27 }
  0x27   : > { %857 = vmatmul.mubr.msk.f32.vlgmr.msra.gmra.mrb[0].mxu1 %vm299_vm0, %v429_v25  ;;  %903 = vmatmul.mubr.msk.f32.gmra.mrb[6].mxu0 %vm299_vm0, %v286_v29 }
  0x28   : > { %579 = vmatprep.mubr.f32.mxu1 %v1083_v7  ;;  %717 = vmatprep.mubr.f32.mxu0 %v1083_v7 }
  0x2b   : > { %858 = vmatmul.mubr.msk.f32.gmra.mrb[2].mxu1 %vm299_vm0, %v430_v28 }
  0x2c   : > { %585 = vmatprep.mubr.f32.mxu1 %v1083_v7 }
  0x2f   : > { %859 = vmatmul.mubr.msk.f32.gmra.mrb[4].mxu1 %vm299_vm0, %v431_v30 }
  0x30   : > { %591 = vmatprep.mubr.f32.mxu1 %v1083_v7 }
  0x33   : > { %860 = vmatmul.mubr.msk.f32.gmra.mrb[6].mxu1 %vm299_vm0, %v432_v31 }
  0x34   : > { %597 = vmatprep.mubr.f32.mxu1 %v1083_v7 }
  0x37   : > { %861 = vmatmul.mubr.msk.f32.gmra.mrb[8].mxu1 %vm299_vm0, %v433_v32 }
  0x38   : > { %603 = vmatprep.mubr.f32.mxu1 %v1083_v7 }
  0x3b   : > { %862 = vmatmul.mubr.msk.f32.gmra.mrb[10].mxu1 %vm299_vm0, %v434_v33 }
  0x3c   : > { %609 = vmatprep.mubr.f32.mxu1 %v1083_v7 }
  0x3f   : > { %863 = vmatmul.mubr.msk.f32.gmra.mrb[12].mxu1 %vm299_vm0, %v435_v34 }
  0x40   : > { %615 = vmatprep.mubr.f32.mxu1 %v1083_v7 }
  0x43   : > { %864 = vmatmul.mubr.msk.f32.gmra.mrb[14].mxu1 %vm299_vm0, %v436_v35 }
  0xee   : > { %v895_v38 = vpop.f32.mrb[0].mxu0 }
  0xef   : > { %v390_v39 = vpop.f32.mrb[1].mxu0  ;;  %v396_v46 = vadd.f32 %v895_v38, %v292_v42 }
  0xf0   : > { %v391_v40 = vadd.f32 %v390_v39, %v291_v37 }
  0xf2   : > { %v898_v43 = vpop.f32.mrb[2].mxu0  ;;  %447 = vperm.xlu0 %979, %v391_v40  }
  0xf3   : > { %v406_v44 = vadd.f32 %v898_v43, %v294_v41  ;;  %v400_v45 = vpop.f32.mrb[3].mxu0 }
  0xf4   : > { %v401_v53 = vadd.f32 %v400_v45, %v293_v47 }
  0xf5   : > { %462 = vperm.xlu1 %980, %v406_v44  }
  0xf6   : > { %v901_v52 = vpop.f32.mrb[4].mxu0  ;;  %452 = vperm.xlu0 %979, %v396_v46  }
  0xf7   : > { %v410_v54 = vpop.f32.mrb[5].mxu0  ;;  %v416_v57 = vadd.f32 %v901_v52, %v296_v51 }
  0xf8   : > { %v411_v55 = vadd.f32 %v410_v54, %v295_v49 }
  0xf9   : > { %457 = vperm.xlu1 %980, %v401_v53  }
  0xfa   : > { %v575_v48 = vpop.f32.mrb[0].mxu1  ;;  %v904_v61 = vpop.f32.mrb[6].mxu0  ;;  %467 = vperm.xlu0 %979, %v411_v55  }
  0xfb   : > { %v577_v50 = vpop.f32.mrb[1].mxu1  ;;  %v420_v62 = vpop.f32.mrb[7].mxu0  ;;  %v426_v1 = vadd.f32 %v904_v61, %v298_v60 }
  0xfc   : > { %v421_v63 = vadd.f32 %v420_v62, %v297_v58  ;;  %v638_v62 = vld [vmem:[%s1341_s4] sm:$0x1] }
  0xfd   : > { %472 = vperm.xlu1 %980, %v416_v57  }
  0xfe   : > { %v581_v56 = vpop.f32.mrb[2].mxu1  ;;  %477 = vperm.xlu0 %979, %v421_v63   ;;  %v645_v63 = vlaneseq }
  0xff   : > { %v583_v59 = vpop.f32.mrb[3].mxu1 }
 0x100   : > { %vm765_vm4 = vcmp.lt.s32.totalorder %v645_v63, 196 }
 0x101   : > { %482 = vperm.xlu1 %980, %v426_v1  }
 0x102   : > { %v587_v0 = vpop.f32.mrb[4].mxu1  ;;  %642 = vperm.xlu0 %979, %v639_v3  }
 0x103   : > { %v589_v2 = vpop.f32.mrb[5].mxu1 }
 0x106   : > { %v593_v4 = vpop.f32.mrb[6].mxu1 }
 0x107   : > { %v595_v5 = vpop.f32.mrb[7].mxu1 }
 0x10a   : > { %v599_v6 = vpop.f32.mrb[8].mxu1 }
 0x10b   : > { %v601_v7 = vpop.f32.mrb[9].mxu1 }
 0x10e   : > { %v605_v8 = vpop.f32.mrb[10].mxu1 }
 0x10f   : > { %v607_v9 = vpop.f32.mrb[11].mxu1 }
 0x112   : > { %v611_v10 = vpop.f32.mrb[12].mxu1 }
 0x113   : > { %v613_v11 = vpop.f32.mrb[13].mxu1 }
 0x116   : > { %v617_v12 = vpop.f32.mrb[14].mxu1 }
 0x117   : > { %v619_v13 = vpop.f32.mrb[15].mxu1 }
 0x171   : > { %v448_v14 = vpop.permute.xlu0 %447 }
 0x172   : > { %v576_v15 = vadd.f32 %v575_v48, %v448_v14  ;;  %v578_v16 = vadd.f32 %v577_v50, %v448_v14 }
 0x174   : > { %v463_v17 = vpop.permute.xlu1 %462  ;;  %981 = vtanh.f32 %v576_v15 }
 0x175   : > { %v594_v18 = vadd.f32 %v593_v4, %v463_v17  ;;  %v596_v19 = vadd.f32 %v595_v5, %v463_v17  ;;  %v453_v20 = vpop.permute.xlu0 %452  ;;  %983 = vtanh.f32 %v578_v16 }
 0x176   : > { %v582_v21 = vadd.f32 %v581_v56, %v453_v20  ;;  %v584_v22 = vadd.f32 %v583_v59, %v453_v20 }
 0x177   : > { %985 = vtanh.f32 %v594_v18 }
 0x178   : > { %987 = vtanh.f32 %v596_v19  ;;  %v458_v23 = vpop.permute.xlu1 %457 }
 0x179   : > { %989 = vtanh.f32 %v582_v21  ;;  %v588_v24 = vadd.f32 %v587_v0, %v458_v23  ;;  %v590_v25 = vadd.f32 %v589_v2, %v458_v23  ;;  %v468_v26 = vpop.permute.xlu0 %467  ;;  %v646_v0 = vshrl.u32 %v645_v63, 7 }
 0x17a   : > { %991 = vtanh.f32 %v584_v22  ;;  %v600_v27 = vadd.f32 %v599_v6, %v468_v26  ;;  %v602_v28 = vadd.f32 %v601_v7, %v468_v26  ;;  %v1085_v22 = vmov 1966171168  }
 0x17b   : > { %993 = vtanh.f32 %v588_v24  ;;  %v647_v1 = vsub.s32 0, %v646_v0  ;;  %v749_v23 = vunpack.c.l.s4 %v1085_v22 }
 0x17c   : > { %995 = vtanh.f32 %v590_v25  ;;  %v473_v29 = vpop.permute.xlu1 %472 }
 0x17d   : > { %997 = vtanh.f32 %v600_v27  ;;  %v606_v30 = vadd.f32 %v605_v8, %v473_v29  ;;  %v608_v31 = vadd.f32 %v607_v9, %v473_v29  ;;  %v478_v32 = vpop.permute.xlu0 %477  ;;  %v750_v24 = vunpack.c.0.s8 %v749_v23 }
 0x17e   : > { %999 = vtanh.f32 %v602_v28  ;;  %v612_v33 = vadd.f32 %v611_v10, %v478_v32  ;;  %v614_v34 = vadd.f32 %v613_v11, %v478_v32  ;;  %v982_v35 = vpop.eup %981 }
 0x17f   : > { %1001 = vtanh.f32 %v606_v30  ;;  %v984_v36 = vpop.eup %983  ;;  %v753_v26 = vsub.s32 %v750_v24, %v646_v0 }
 0x180   : > { %1003 = vtanh.f32 %v608_v31  ;;  %v483_v37 = vpop.permute.xlu1 %482 }
 0x181   : > { %v986_v38 = vpop.eup %985  ;;  %1005 = vtanh.f32 %v612_v33  ;;  %v618_v39 = vadd.f32 %v617_v12, %v483_v37  ;;  %v620_v40 = vadd.f32 %v619_v13, %v483_v37  ;;  %v643_v2 = vpop.permute.xlu0 %642 }
 0x182   : > { %v988_v41 = vpop.eup %987  ;;  %1007 = vtanh.f32 %v614_v34  ;;  %v648_v3 = vrot.slane %v643_v2, %v647_v1 }
 0x183   : > { %v990_v42 = vpop.eup %989  ;;  %1009 = vtanh.f32 %v618_v39 }
 0x184   : > { %v992_v43 = vpop.eup %991  ;;  %1011 = vtanh.f32 %v620_v40  ;;  %v923_v44 = vpack.c.bf16 %v990_v42, %v982_v35 }
 0x185   : > { %v994_v45 = vpop.eup %993  ;;  %v921_v46 = vpack.c.bf16 %v992_v43, %v984_v36 }
 0x186   : > { %v996_v47 = vpop.eup %995  ;;  %v927_v48 = vpack.c.bf16 %v986_v38, %v994_v45 }
 0x187   : > { %v998_v49 = vpop.eup %997  ;;  %922 = vmatprep.subr.bf16.mxu0 %v921_v46  ;;  %v925_v50 = vpack.c.bf16 %v988_v41, %v996_v47 }
 0x188   : > { %v1000_v51 = vpop.eup %999  ;;  %924 = vmatpush1.bf16.msra.mxu0 %v923_v44 }
 0x189   : > { %v1002_v52 = vpop.eup %1001  ;;  %926 = vmatprep.subr.bf16.mxu0 %v925_v50 }
 0x18a   : > { %v1004_v53 = vpop.eup %1003  ;;  %v931_v54 = vpack.c.bf16 %v1002_v52, %v998_v49 }
 0x18b   : > { %v1006_v55 = vpop.eup %1005  ;;  %v929_v56 = vpack.c.bf16 %v1004_v53, %v1000_v51 }
 0x18c   : > { %v1008_v57 = vpop.eup %1007  ;;  %928 = vmatpush1.bf16.msra.mxu0 %v927_v48 }
 0x18d   : > { %v1010_v58 = vpop.eup %1009  ;;  %930 = vmatprep.subr.bf16.mxu0 %v929_v56 }
 0x18e   : > { %v1012_v59 = vpop.eup %1011  ;;  %v935_v60 = vpack.c.bf16 %v1010_v58, %v1006_v55 }
 0x18f   : > { %v933_v61 = vpack.c.bf16 %v1012_v59, %v1008_v57 }
 0x190   : > { %932 = vmatpush1.bf16.msra.mxu0 %v931_v54 }
 0x191   : > { %934 = vmatprep.subr.bf16.mxu0 %v933_v61 }
 0x194   : > { %936 = vmatpush1.bf16.msra.mxu0 %v935_v60 }
 0x197   : > { %865 = vmatmul.mubr.msk.f32.vlgmr.msra.gmra.mrb[8].mxu0 %vm649_vm1, %v638_v62 }
 0x26a   : > { %v719_v4 = vpop.f32.mrb[8].mxu0 }
 0x26b   : > { %v720_v5 = vadd.f32 %v719_v4, %v648_v3  ;;  %v721_v6 = vpop.f32.mrb[9].mxu0 }
 0x26c   : > { %v722_v7 = vadd.f32 %v721_v6, %v648_v3 }
 0x26d   : > { %v725_v8 = vsel %vm724_vm2, %v720_v5, -inf }
 0x26e   : > { %v727_v9 = vsel %vm726_vm3, %v722_v7, -inf }
 0x26f   : > { %v728_v10 = vmax.f32 %v725_v8, %v727_v9 }
 0x271   : > { %729 = vmax.xlane.f32.xlu1 %v728_v10 }
 0x2fe   : > { %v730_v11 = vpop.xlane.xlu1 %729 }
 0x2ff   : > { %v731_v12 = vsub.f32 %v720_v5, %v730_v11  ;;  %v732_v13 = vsub.f32 %v722_v7, %v730_v11 }
 0x301   : > { %v733_v14 = vmul.f32 1.442695, %v731_v12  ;;  %v735_v15 = vmul.f32 1.442695, %v732_v13 }
 0x303   : > { %1013 = vpow2.f32 %v733_v14 }
 0x304   : > { %1015 = vpow2.f32 %v735_v15 }
 0x30d   : > { %v1014_v16 = vpop.eup %1013 }
 0x30e   : > { %v1016_v17 = vpop.eup %1015  ;;  %v737_v18 = vsel %vm724_vm2, %v1014_v16, 0.0 }
 0x30f   : > { %v738_v19 = vsel %vm726_vm3, %v1016_v17, 0.0 }
 0x310   : > { %v739_v20 = vadd.f32 %v738_v19, %v737_v18 }
 0x312   : > { %740 = vadd.xlane.f32.xlu0 %v739_v20 }
 0x39f   : > { %v741_v21 = vpop.xlane.xlu0 %740 }
 0x3a0   : > { %1017 = vrcp.f32 %v741_v21 }
 0x3aa   : > { %v1018_v25 = vpop.eup %1017 }
 0x3ab   : > { %v743_v27 = vmul.f32 %v1018_v25, %v1014_v16  ;;  %v744_v28 = vmul.f32 %v1018_v25, %v1016_v17 }
 0x3ad   : > { %v747_v29 = vcombine.low %v743_v27, %v744_v28 }
 0x3af   : > { %v754_v30 = vrot.slane %v747_v29, %v753_v26 }
 0x3b1   : > { %v761_v31 = vrot.slane %v754_v30, %v753_v26 }
 0x3b3   : > { %767 = vst.msk [vmem:[%s273_s20] sm:$0x3] %vm765_vm4, %v761_v31 }
 0x3b4   : > { %1032 = shalt.err (!%p1029_p3)
}
 0x3b5   : > { %s1033_s14 = scalar_lea.hbm %s1295_s24, 32  ;;  %s1037_s17 = scalar_lea.hbm %s1344_s7, 64 }
 0x3b6   : > { %p1034_p4 = scmp.ne.s32.totalorder %s1295_s24, %s1033_s14  ;;  %p1038_p9 = scmp.lt.u32.totalorder %s1295_s24, %s1344_s7 }
 0x3b7   : > { %p1039_p10 = scmp.lt.u32.totalorder %s1037_s17, %s1033_s14  ;;  %p1041_p12 = scmp.lt.u32.totalorder %s1033_s14, %s1295_s24 }
 0x3b8   : > { %p1035_p7 = pnand %p1034_p4, %p1168_p5 }
 0x3b9   : > { %p1040_p11 = por %p1039_p10, %p1038_p9 }
 0x3ba   : > { %p1036_p8 = pneg %p1035_p7 }
 0x3bb   : > { %p1042_p13 = por %p1041_p12, %p1040_p11 }
 0x3bd   : > { %p1043_p0 = pnand %p1042_p13, %p1036_p8 }
 0x3bf   : > { %1046 = shalt.err (!%p1043_p0)
}
 0x3c0   : > { %937 = dma.vmem_to_hbm [thread:$0]  (%p1168_p5), %s1297_s21, 32, %s1295_s24, %s769_s25  }
 0x3c1 PF: > { %p943_p1 = scmp.ge.s32.totalorder %s1081_s29, 2  ;;  %s795_s20 = sand.u32 1, %s1069_s26  }
 0x3c2   : > { %s796_s22 = scalar_lea.sflag [#allocation4], %s795_s20 }
 0x3c3   : > { %p940_p2 = pnand %p943_p1, %p1172_p6 }
 0x3c5   : > { %1064 = dma.done.wait (!%p940_p2), %s796_s22, 32  }
 0x3c6   : > { %1066 = vsyncadd (!%p940_p2), %s796_s22, 4294967264  ;;  %p19_p3 = scmp.ge.s32.totalorder %s1155_s8, 4   ;;  %s1347_s26 = smov %s1073_s27 }
 0x3c7   : > { %s1348_s27 = smov %s1077_s28  ;;  %s1349_s28 = smov %s1166_s11 }
 0x3c8   : > { %s1350_s29 = smov %s1155_s8  ;;  %21 = sbr.rel (!%p19_p3) target bundleno = 6 (0x6), region = 83 }
 0x3cf   :  { %801 = vsyncpa [#allocation4], 1 }
 0x3d0   :  { %803 = vsyncpa [#allocation4 + $0x1], 1 }

</bundles_post_ra>
